<compile_context>
chip_gen: v6e
topology: v6e:2x2x1
jax: 0.10.0
libtpu: 0.0.40
codegen_flags: <defaults>
</compile_context>

<pallas_src>
import jax
import jax.numpy as jnp
from jax import lax
from jax.experimental import pallas as pl
from jax.experimental.pallas import tpu as pltpu


def _round_up(x, m):
    return (x + m - 1) // m * m


def mlp_kernel(x_ref, w1_ref, b1_ref, w2_ref, b2_ref, o_ref):
    # fc1: hidden = x @ W1^T + b1.  Contract x dim-1 against W1 dim-1 so the PyTorch
    # (out_features, in_features) weight layout is used as-is (no transpose copies).
    h = lax.dot_general(
        x_ref[...], w1_ref[...],
        dimension_numbers=(((1,), (1,)), ((), ())),
        preferred_element_type=jnp.float32)
    h = h + b1_ref[...]                       # bias add in f32 (VPU-safe on v5e)

    # fc2: output = hidden @ W2^T + b2  (no nonlinearity, matches the module).
    out = lax.dot_general(
        h.astype(w2_ref.dtype), w2_ref[...],  # MXU operands in the compute dtype
        dimension_numbers=(((1,), (1,)), ((), ())),
        preferred_element_type=jnp.float32)
    out = out + b2_ref[...]
    o_ref[...] = out.astype(o_ref.dtype)      # single final cast, lane-dense store


def simple_mlp_forward(x, w1, b1, w2, b2, *, tile_b=512, compute_dtype=None):
    """x: (B, in_dim); w1: (hidden, in_dim); b1: (hidden,);
    w2: (out_dim, hidden); b2: (out_dim,).  Returns (B, out_dim) in x.dtype."""
    B, in_dim = x.shape
    hidden_dim = w1.shape[0]
    out_dim = w2.shape[0]
    out_dtype = x.dtype
    if compute_dtype is None:
        compute_dtype = x.dtype
    compute_dtype = jnp.dtype(compute_dtype)
    itemsize = compute_dtype.itemsize

    # Lane-dense padding of feature dims to multiples of 128 (done once per call here;
    # in a real model this would live at parameter-init time).
    in_p = _round_up(in_dim, 128)
    hid_p = _round_up(hidden_dim, 128)
    out_p = _round_up(out_dim, 128)

    # Sublane multiple: 8 for 4-byte, 16 for 2-byte (bf16), 32 for 1-byte dtypes.
    sub_mult = {4: 8, 2: 16, 1: 32}.get(itemsize, 8)
    tile_b = max(sub_mult, min(tile_b, _round_up(B, sub_mult)))
    tile_b = _round_up(tile_b, sub_mult)
    b_p = _round_up(B, tile_b)
    grid = (b_p // tile_b,)

    def pad2(a, r, c, dt):
        return jnp.pad(a, ((0, r - a.shape[0]), (0, c - a.shape[1]))).astype(dt)

    xp = pad2(x, b_p, in_p, compute_dtype)
    w1p = pad2(w1, hid_p, in_p, compute_dtype)
    w2p = pad2(w2, out_p, hid_p, compute_dtype)
    b1p = jnp.pad(b1, (0, hid_p - hidden_dim)).reshape(1, hid_p).astype(jnp.float32)
    b2p = jnp.pad(b2, (0, out_p - out_dim)).reshape(1, out_p).astype(jnp.float32)

    # VMEM budget: double-buffered x/out tiles + resident weights/biases + f32 hidden.
    needed = (2 * tile_b * in_p * itemsize                   # x tiles (double-buffered)
              + 2 * tile_b * out_p * out_dtype.itemsize      # out tiles (double-buffered)
              + (hid_p * in_p + out_p * hid_p) * itemsize    # resident weights
              + (hid_p + out_p) * 4                          # resident biases (f32)
              + tile_b * hid_p * 4)                          # f32 hidden intermediate
    vmem_limit = min(max(2 * needed + (4 << 20), 32 << 20), 48 << 20)  # v7x-safe cap

    flops = 2 * b_p * hid_p * in_p + 2 * b_p * out_p * hid_p
    bytes_accessed = (xp.size * itemsize + w1p.size * itemsize + w2p.size * itemsize
                      + b1p.size * 4 + b2p.size * 4 + b_p * out_p * out_dtype.itemsize)

    out_padded = pl.pallas_call(
        mlp_kernel,
        out_shape=jax.ShapeDtypeStruct((b_p, out_p), out_dtype),
        grid_spec=pltpu.PrefetchScalarGridSpec(
            num_scalar_prefetch=0,
            grid=grid,
            in_specs=[
                pl.BlockSpec((tile_b, in_p), lambda i: (i, 0)),   # x: batch-tiled
                pl.BlockSpec((hid_p, in_p), lambda i: (0, 0)),    # W1: VMEM-resident
                pl.BlockSpec((1, hid_p), lambda i: (0, 0)),       # b1: resident
                pl.BlockSpec((out_p, hid_p), lambda i: (0, 0)),   # W2: VMEM-resident
                pl.BlockSpec((1, out_p), lambda i: (0, 0)),       # b2: resident
            ],
            out_specs=pl.BlockSpec((tile_b, out_p), lambda i: (i, 0)),
        ),
        compiler_params=pltpu.CompilerParams(
            dimension_semantics=("parallel",),
            vmem_limit_bytes=int(vmem_limit),
        ),
        cost_estimate=pl.CostEstimate(
            flops=flops, transcendentals=0, bytes_accessed=int(bytes_accessed)),
    )(xp, w1p, b1p, w2p, b2p)

    return out_padded[:B, :out_dim]


def init_params(key, input_dim, hidden_dim, output_dim):
    """Deterministic init mirroring the module: weights ~ N(0, 0.1),
    biases use PyTorch Linear default U(-1/sqrt(fan_in), 1/sqrt(fan_in))."""
    k1, k2, k3, k4 = jax.random.split(key, 4)
    w1 = 0.1 * jax.random.normal(k1, (hidden_dim, input_dim), jnp.float32)
    bound1 = 1.0 / jnp.sqrt(input_dim)
    b1 = jax.random.uniform(k2, (hidden_dim,), jnp.float32, -bound1, bound1)
    w2 = 0.1 * jax.random.normal(k3, (output_dim, hidden_dim), jnp.float32)
    bound2 = 1.0 / jnp.sqrt(hidden_dim)
    b2 = jax.random.uniform(k4, (output_dim,), jnp.float32, -bound2, bound2)
    return w1, b1, w2, b2


if __name__ == "__main__":
    input_dim, hidden_dim, output_dim = 16, 32, 8
    batch = 16

    key = jax.random.PRNGKey(0)
    kx, kp = jax.random.split(key)
    x = jax.random.normal(kx, (batch, input_dim), jnp.float32)
    w1, b1, w2, b2 = init_params(kp, input_dim, hidden_dim, output_dim)

    ref = (x @ w1.T + b1) @ w2.T + b2

    # f32 path (tile_b=8 -> 2 grid steps, exercises the batch pipeline); tight check.
    out = simple_mlp_forward(x, w1, b1, w2, b2, tile_b=8)
    out = jax.block_until_ready(out)
    assert out.shape == (batch, output_dim)
    assert jnp.allclose(out, ref, atol=1e-5, rtol=1e-5)

    # bf16-operand path (MXU-friendly on v6e/v7x; accumulation stays f32); looser check.
    out_bf16 = simple_mlp_forward(x, w1, b1, w2, b2, tile_b=8,
                                  compute_dtype=jnp.bfloat16)
    out_bf16 = jax.block_until_ready(out_bf16)
    assert out_bf16.shape == (batch, output_dim)
    assert jnp.allclose(out_bf16.astype(jnp.float32), ref, atol=5e-2, rtol=5e-2)

    print("KERNEL_OK")
</pallas_src>

<mosaic_0001>
module attributes {stable_mosaic.version = 11 : i64} {
  func.func @mlp_kernel(%arg0: i32, %arg1: memref<8x128xf32, #tpu.memory_space<vmem>>, %arg2: memref<128x128xf32, #tpu.memory_space<vmem>>, %arg3: memref<1x128xf32, #tpu.memory_space<vmem>>, %arg4: memref<128x128xf32, #tpu.memory_space<vmem>>, %arg5: memref<1x128xf32, #tpu.memory_space<vmem>>, %arg6: memref<8x128xf32, #tpu.memory_space<vmem>>) attributes {dimension_semantics = [#tpu.dimension_semantics<parallel>], iteration_bounds = array<i64: 2>, scalar_prefetch = 0 : i64, scratch_operands = 0 : i64, tpu.core_type = #tpu.core_type<tc>, window_params = [{transform_indices = @transform_0, window_bounds = array<i64: 8, 128>}, {pipeline_mode = #tpu.pipeline_mode<synchronous>, transform_indices = @transform_1, window_bounds = array<i64: 128, 128>}, {pipeline_mode = #tpu.pipeline_mode<synchronous>, transform_indices = @transform_2, window_bounds = array<i64: 1, 128>}, {pipeline_mode = #tpu.pipeline_mode<synchronous>, transform_indices = @transform_3, window_bounds = array<i64: 128, 128>}, {pipeline_mode = #tpu.pipeline_mode<synchronous>, transform_indices = @transform_4, window_bounds = array<i64: 1, 128>}, {transform_indices = @transform_5, window_bounds = array<i64: 8, 128>}]} {
    %c0 = arith.constant 0 : index
    %c0_0 = arith.constant 0 : index
    %0 = vector.load %arg1[%c0, %c0_0] : memref<8x128xf32, #tpu.memory_space<vmem>>, vector<8x128xf32>
    %c0_1 = arith.constant 0 : index
    %c0_2 = arith.constant 0 : index
    %1 = vector.load %arg2[%c0_1, %c0_2] : memref<128x128xf32, #tpu.memory_space<vmem>>, vector<128x128xf32>
    %cst = arith.constant dense<0.000000e+00> : vector<8x128xf32>
    %2 = tpu.matmul %0, %1, %cst {dimension_numbers = #tpu.dot_dimension_numbers<[1], [1], [0], [0], [0, 0, 1, 0], [], []>} : vector<8x128xf32>, vector<128x128xf32>, vector<8x128xf32> -> vector<8x128xf32>
    %c0_3 = arith.constant 0 : index
    %c0_4 = arith.constant 0 : index
    %3 = vector.load %arg3[%c0_3, %c0_4] : memref<1x128xf32, #tpu.memory_space<vmem>>, vector<1x128xf32>
    %4 = vector.broadcast %3 : vector<1x128xf32> to vector<8x128xf32>
    %5 = arith.addf %2, %4 : vector<8x128xf32>
    %c0_5 = arith.constant 0 : index
    %c0_6 = arith.constant 0 : index
    %6 = vector.load %arg4[%c0_5, %c0_6] : memref<128x128xf32, #tpu.memory_space<vmem>>, vector<128x128xf32>
    %cst_7 = arith.constant dense<0.000000e+00> : vector<8x128xf32>
    %7 = tpu.matmul %5, %6, %cst_7 {dimension_numbers = #tpu.dot_dimension_numbers<[1], [1], [0], [0], [0, 0, 1, 0], [], []>} : vector<8x128xf32>, vector<128x128xf32>, vector<8x128xf32> -> vector<8x128xf32>
    %c0_8 = arith.constant 0 : index
    %c0_9 = arith.constant 0 : index
    %8 = vector.load %arg5[%c0_8, %c0_9] : memref<1x128xf32, #tpu.memory_space<vmem>>, vector<1x128xf32>
    %9 = vector.broadcast %8 : vector<1x128xf32> to vector<8x128xf32>
    %10 = arith.addf %7, %9 : vector<8x128xf32>
    %c0_10 = arith.constant 0 : index
    %c0_11 = arith.constant 0 : index
    %11 = vector.load %arg6[%c0_10, %c0_11] : memref<8x128xf32, #tpu.memory_space<vmem>>, vector<8x128xf32>
    tpu.vector_store %arg6[%c0_10, %c0_11], %10 {strides = array<i32>} : memref<8x128xf32, #tpu.memory_space<vmem>>, vector<8x128xf32>,
    return
  }
  func.func @transform_0(%arg0: i32) -> (i32, i32) {
    %c0_i32 = arith.constant 0 : i32
    %c0_i32_0 = arith.constant 0 : i32
    return %arg0, %c0_i32 : i32, i32
  }
  func.func @transform_1(%arg0: i32) -> (i32, i32) {
    %c0_i32 = arith.constant 0 : i32
    %c0_i32_0 = arith.constant 0 : i32
    %c0_i32_1 = arith.constant 0 : i32
    return %c0_i32, %c0_i32_0 : i32, i32
  }
  func.func @transform_2(%arg0: i32) -> (i32, i32) {
    %c0_i32 = arith.constant 0 : i32
    %c0_i32_0 = arith.constant 0 : i32
    %c0_i32_1 = arith.constant 0 : i32
    return %c0_i32, %c0_i32_0 : i32, i32
  }
  func.func @transform_3(%arg0: i32) -> (i32, i32) {
    %c0_i32 = arith.constant 0 : i32
    %c0_i32_0 = arith.constant 0 : i32
    %c0_i32_1 = arith.constant 0 : i32
    return %c0_i32, %c0_i32_0 : i32, i32
  }
  func.func @transform_4(%arg0: i32) -> (i32, i32) {
    %c0_i32 = arith.constant 0 : i32
    %c0_i32_0 = arith.constant 0 : i32
    %c0_i32_1 = arith.constant 0 : i32
    return %c0_i32, %c0_i32_0 : i32, i32
  }
  func.func @transform_5(%arg0: i32) -> (i32, i32) {
    %c0_i32 = arith.constant 0 : i32
    %c0_i32_0 = arith.constant 0 : i32
    return %arg0, %c0_i32 : i32, i32
  }
}

</mosaic_0001>

<bundles_post_ra>
// kernel: tpu_custom_call.1
= control target key start
LH: loop header
LB: loop body
LE: loop exit
PB: predicated region body
PF: predicated region fallthrough
CT: control target
= control target key end

     0   :  { %10 = vsyncpa [#allocation3], 0  ;;  %s1159_s0 = inlined_call_operand.hbm [shape: f32[16,128], index: 0, kind: input, shape index: {}]   ;;  %s1160_s1 = inlined_call_operand.hbm [shape: f32[128,128], index: 1, kind: input, shape index: {}]   ;;  %s1161_s2 = inlined_call_operand.vmem [shape: f32[1,128], index: 2, kind: input, shape index: {}]   ;;  %s1162_s3 = inlined_call_operand.hbm [shape: f32[128,128], index: 3, kind: input, shape index: {}]   ;;  %s1163_s4 = inlined_call_operand.vmem [shape: f32[1,128], index: 4, kind: input, shape index: {}]   ;;  %s1164_s5 = inlined_call_operand.hbm [shape: f32[16,128], index: 5, kind: output, shape index: {}]  }
   0x1   :  { %12 = vsyncpa [#allocation3 + $0x1], 0 }
   0x2   :  { %13 = vsyncpa [#allocation6], 0 }
   0x3   :  { %14 = vsyncpa [#allocation4], 0 }
   0x4   :  { %16 = vsyncpa [#allocation4 + $0x1], 0  ;;  %s941_s18 = smov 0   ;;  %s943_s19 = smov 0  }
   0x5   :  { %s945_s20 = smov 0   ;;  %s947_s21 = smov 0  }
   0x6 LB: > { %s962_s22 = sadd.s32 4294967295, %s901_s21   ;;  %s560_s23 = sadd.s32 4294967294, %s901_s21   ;;  %s901_s21 = sphi %s947_s21, %s1186_s21   ;;  %s897_s20 = sphi %s945_s20, %s1185_s20   ;;  %s893_s19 = sphi %s943_s19, %s1184_s19   ;;  %s889_s18 = sphi %s941_s18, %s1183_s18  }
   0x7   : > { %p42_p0 = scmp.ne.s32.totalorder %s893_s19, %s889_s18  ;;  %p1165_p1 = scmp.eq.s32.totalorder %s962_s22, 0 }
   0x8   : > { %p156_p3 = scmp.eq.s32.totalorder %s560_s23, 1  ;;  %p561_p5 = scmp.ge.s32.totalorder %s901_s21, 1 }
   0x9   : > { %p971_p4 = por %p1165_p1, %p42_p0  ;;  %p163_p7 = scmp.lt.s32.totalorder %s901_s21, 3 }
   0xa   : > { %p976_p6 = por %p156_p3, %p42_p0  ;;  %s903_s27 = smov [#allocation5]  }
   0xb   : > { %s1169_s24 = scalar_select %p971_p4, 1, 0 }
   0xc   : > { %s1170_s25 = scalar_select %p976_p6, 1, 0 }
   0xd   : > { %p981_p8 = pnand %p561_p5, %p163_p7  ;;  %s175_s28 = sshll.u32 %s903_s27, 4  ;;  %s176_s28 = int_to_ptr.vmem [resolvable:$true] %s175_s28 }
   0xe   : > { %s904_s30 = smov [#allocation7]   ;;  %s764_s7 = scalar_lea.vmem %s176_s28, 2048 }
   0xf   : > { %s1171_s26 = scalar_select %p981_p8, 1, 0 }
  0x10   : > { %p694_p9 = pneg %p981_p8  ;;  %s191_s6 = sshll.u32 %s904_s30, 4  ;;  %s192_s6 = int_to_ptr.vmem [resolvable:$true] %s191_s6 }
  0x11   : > { %p765_p13 = scmp.ne.s32.totalorder %s176_s28, %s764_s7  ;;  %p772_p5 = scmp.lt.s32.totalorder %s176_s28, %s176_s28 }
  0x12   : > { %p990_p11 = pnand %p694_p9, %p1165_p1  ;;  %p773_p7 = scmp.lt.s32.totalorder %s764_s7, %s764_s7 }
  0x14   : > { %p755_p12 = pneg %p990_p11  ;;  %p774_p10 = por %p773_p7, %p772_p5 }
  0x16   : > { %p767_p0 = pnand %p765_p13, %p755_p12 }
  0x18   : > { %p768_p3 = pneg %p767_p0 }
  0x1a   : > { %p775_p9 = pnand %p774_p10, %p768_p3 }
  0x1c   : > { %778 = shalt.err (!%p775_p9)
}
  0x1d   : > { %s905_s8 = smov 128   ;;  %s906_s9 = smov 8  }
  0x1e   : > { %697 = dma.hbm_to_vmem [thread:$0]  (!%p990_p11), %s1160_s1, 2048, %s176_s28, [#allocation6], %s905_s8, %s905_s8, %s906_s9  }
  0x1f   : > { %s790_s12 = scalar_lea.vmem %s192_s6, 2048  ;;  %p798_p2 = scmp.lt.s32.totalorder %s192_s6, %s192_s6 }
  0x20   : > { %p791_p1 = scmp.ne.s32.totalorder %s192_s6, %s790_s12  ;;  %p799_p6 = scmp.lt.s32.totalorder %s790_s12, %s790_s12 }
  0x22   : > { %p793_p13 = pnand %p791_p1, %p755_p12  ;;  %p800_p5 = por %p799_p6, %p798_p2 }
  0x24   : > { %p794_p0 = pneg %p793_p13 }
  0x26   : > { %p801_p10 = pnand %p800_p5, %p794_p0 }
  0x28   : > { %804 = shalt.err (!%p801_p10)
}
  0x29   : > { %700 = dma.hbm_to_vmem [thread:$0]  (!%p990_p11), %s1162_s3, 2048, %s192_s6, [#allocation6], %s905_s8, %s905_s8, %s906_s9  }
  0x2a   : > { %s1013_s15 = sadd.s32 1, %s901_s21   ;;  %s29_s16 = sadd.s32 1, %s897_s20 }
  0x2b   : > { %s26_s17 = ssub.s32 %s901_s21, %s1013_s15  ;;  %p36_p1 = scmp.ne.s32.totalorder %s897_s20, %s893_s19 }
  0x2c   : > { %p27_p2 = scmp.eq.s32.totalorder %s26_s17, 0  ;;  %p37_p6 = scmp.eq.s32.totalorder %s901_s21, 0 }
  0x2d   : > { %p1173_p12 = scmp.eq.s32.totalorder %s962_s22, 1  ;;  %p711_p7 = scmp.lt.s32.totalorder %s901_s21, 2 }
  0x2e   : > { %s1029_s27 = scalar_select %p27_p2, %s897_s20, %s29_s16  }
  0x2f   : > { %p1023_p3 = por %p1173_p12, %p36_p1  ;;  %p38_p9 = por %p37_p6, %p36_p1 }
  0x30   : > { %s208_s28 = sand.u32 1, %s897_s20   ;;  %s566_s30 = sshll.u32 %s901_s21, 7 }
  0x31   : > { %s1174_s23 = scalar_select %p1023_p3, 1, 0 }
  0x32   : > { %s565_s29 = sshll.u32 %s208_s28, 3  ;;  %s1036_s8 = scalar_lea.hbm %s1159_s0, %s566_s30 }
  0x33   : > { %s212_s9 = scalar_lea.vmem [#allocation2], %s565_s29  ;;  %p1038_p11 = pnand %p711_p7, %p38_p9 }
  0x34   : > { %s219_s10 = sshll.u32 %s212_s9, 4  ;;  %s209_s12 = scalar_lea.sflag [#allocation3], %s208_s28  ;;  %s220_s10 = int_to_ptr.vmem [resolvable:$true] %s219_s10 }
  0x35   : > { %s805_s13 = scalar_lea.hbm %s1036_s8, 128  ;;  %p807_p0 = pneg %p1038_p11 }
  0x36   : > { %p806_p13 = scmp.ne.s32.totalorder %s1036_s8, %s805_s13  ;;  %s810_s17 = scalar_lea.hbm %s1159_s0, 256 }
  0x37   : > { %p811_p1 = scmp.lt.s32.totalorder %s1036_s8, %s1159_s0  ;;  %p812_p2 = scmp.lt.s32.totalorder %s810_s17, %s805_s13 }
  0x38   : > { %p808_p5 = pnand %p807_p0, %p806_p13 }
  0x39   : > { %p813_p6 = por %p812_p2, %p811_p1 }
  0x3a   : > { %p809_p10 = pneg %p808_p5 }
  0x3c   : > { %p814_p12 = pnand %p813_p6, %p809_p10 }
  0x3e   : > { %817 = shalt.err (!%p814_p12)
}
  0x3f   : > { %s818_s6 = scalar_lea.vmem %s220_s10, 128  ;;  %s907_s28 = smov [#allocation2]  }
  0x40   : > { %p819_p7 = scmp.ne.s32.totalorder %s220_s10, %s818_s6  ;;  %s823_s7 = sshll.u32 %s907_s28, 4  ;;  %s824_s7 = int_to_ptr.vmem [resolvable:$false] %s823_s7 }
  0x41   : > { %s825_s9 = scalar_lea.vmem %s824_s7, 256  ;;  %p826_p13 = scmp.lt.s32.totalorder %s220_s10, %s824_s7 }
  0x42   : > { %p821_p9 = pnand %p819_p7, %p807_p0  ;;  %p827_p5 = scmp.lt.s32.totalorder %s825_s9, %s818_s6 }
  0x44   : > { %p822_p3 = pneg %p821_p9  ;;  %p828_p4 = por %p827_p5, %p826_p13 }
  0x46   : > { %p829_p8 = pnand %p828_p4, %p822_p3 }
  0x48   : > { %832 = shalt.err (!%p829_p8)
}
  0x49   : > { %704 = dma.hbm_to_vmem [thread:$0]  (!%p1038_p11), %s1036_s8, 128, %s220_s10, %s209_s12  }
  0x4a   : > { %p1176_p10 = scmp.ne.s32.totalorder %s1171_s26, 0 }
  0x4b   : > { %s1059_s13 = sand.u32 (!%p1176_p10), 1, %s893_s19   ;;  %p1177_p4 = scmp.ne.s32.totalorder (!%p1176_p10), %s1169_s24, 0 }
  0x4c   : > { %228 = sbr.rel (%p1176_p10) target bundleno = 554 (0x22a), region = 40  ;;  %s568_s14 = sshll.u32 (!%p1176_p10), %s1059_s13, 3 }
  0x4d   : > { %s231_s16 = scalar_lea.sflag (!%p1176_p10), [#allocation3], %s1059_s13  ;;  %s1065_s17 = scalar_lea.vmem (!%p1176_p10), [#allocation2], %s568_s14 }
  0x51   : > { %876 = dma.done.wait (%p1177_p4), %s231_s16, 128  }
  0x52   : > { %878 = vsyncadd (%p1177_p4), %s231_s16, 4294967168  ;;  %p1178_p8 = scmp.eq.s32.totalorder %s962_s22, 0 }
  0x54   : > { %880 = dma.done.wait (%p1178_p8), [#allocation6], 4096   ;;  %p1179_p3 = pmov %p1178_p8 }
  0x55   : > { %v908_v0 = vmov 0.0   ;;  %vm909_vm0 = vmmov 0   ;;  %v285_v1 = vld [vmem:[#allocation5 + $0x78] sm:$0xff]  ;;  %v284_v2 = vld [vmem:[#allocation5 + $0x70] sm:$0xff]  ;;  %v283_v4 = vld [vmem:[#allocation5 + $0x68] sm:$0xff]  ;;  %s575_s11 = sshll.u32 %s962_s22, 7 }
  0x56   : > { %882 = vsyncadd (%p1179_p3), [#allocation6], 4294963200  ;;  %612 = vmatprep.subr.mxu0 %v908_v0  ;;  %644 = vmatprep.mubr.msk.f32.mxu0 %vm909_vm0, %v908_v0  ;;  %v378_v3 = vld [vmem:[#allocation7 + $0x78] sm:$0xff]  ;;  %v377_v5 = vld [vmem:[#allocation7 + $0x70] sm:$0xff]  ;;  %s268_s12 = scalar_lea.vmem [#allocation8], %s568_s14  ;;  %s1122_s28 = scalar_lea.hbm %s1164_s5, %s575_s11 }
  0x57   : > { %647 = vmatprep.subr.mxu1 %v908_v0  ;;  %679 = vmatprep.mubr.msk.f32.mxu1 %vm909_vm0, %v908_v0  ;;  %v282_v6 = vld [vmem:[#allocation5 + $0x60] sm:$0xff]  ;;  %v376_v7 = vld [vmem:[#allocation7 + $0x68] sm:$0xff]  ;;  %v281_v8 = vld [vmem:[#allocation5 + $0x58] sm:$0xff]  ;;  %s471_s30 = sshll.u32 %s268_s12, 4  ;;  %s458_s7 = scalar_lea.sflag [#allocation4], %s1059_s13  ;;  %s472_s30 = int_to_ptr.vmem [resolvable:$true] %s471_s30 }
  0x58   : > { %613 = vmatpush3.xpose.msra.mxu0 %v285_v1  ;;  %648 = vmatpush3.xpose.msra.mxu1 %v378_v3  ;;  %v375_v9 = vld [vmem:[#allocation7 + $0x60] sm:$0xff]  ;;  %v280_v10 = vld [vmem:[#allocation5 + $0x50] sm:$0xff]  ;;  %v374_v11 = vld [vmem:[#allocation7 + $0x58] sm:$0xff]  ;;  %s833_s9 = scalar_lea.vmem %s472_s30, 128  ;;  %p1180_p0 = scmp.ne.s32.totalorder %s1174_s23, 0 }
  0x59   : > { %614 = vmatprep.subr.mxu0 %v908_v0  ;;  %649 = vmatprep.subr.mxu1 %v908_v0  ;;  %v279_v12 = vld [vmem:[#allocation5 + $0x48] sm:$0xff]  ;;  %v373_v13 = vld [vmem:[#allocation7 + $0x50] sm:$0xff]  ;;  %v278_v14 = vld [vmem:[#allocation5 + $0x40] sm:$0xff]  ;;  %p834_p11 = scmp.ne.s32.totalorder %s472_s30, %s833_s9  ;;  %s910_s22 = smov [#allocation8]  }
  0x5a   : > { %v372_v15 = vld [vmem:[#allocation7 + $0x48] sm:$0xff]  ;;  %v277_v16 = vld [vmem:[#allocation5 + $0x38] sm:$0xff]  ;;  %v371_v17 = vld [vmem:[#allocation7 + $0x40] sm:$0xff]  ;;  %s837_s16 = sshll.u32 %s910_s22, 4  ;;  %s838_s16 = int_to_ptr.vmem [resolvable:$false] %s837_s16 }
  0x5b   : > { %v276_v18 = vld [vmem:[#allocation5 + $0x30] sm:$0xff]  ;;  %v370_v19 = vld [vmem:[#allocation7 + $0x38] sm:$0xff]  ;;  %v275_v20 = vld [vmem:[#allocation5 + $0x28] sm:$0xff]  ;;  %p835_p1 = pnand %p834_p11, %p1180_p0  ;;  %s839_s14 = scalar_lea.vmem %s838_s16, 256 }
  0x5c   : > { %615 = vmatpush3.xpose.msra.mxu0 %v284_v2  ;;  %650 = vmatpush3.xpose.msra.mxu1 %v377_v5  ;;  %v369_v21 = vld [vmem:[#allocation7 + $0x30] sm:$0xff]  ;;  %v274_v22 = vld [vmem:[#allocation5 + $0x20] sm:$0xff]  ;;  %v368_v23 = vld [vmem:[#allocation7 + $0x28] sm:$0xff]  ;;  %p840_p6 = scmp.lt.s32.totalorder %s472_s30, %s838_s16  ;;  %p841_p12 = scmp.lt.s32.totalorder %s839_s14, %s833_s9 }
  0x5d   : > { %616 = vmatprep.subr.mxu0 %v908_v0  ;;  %651 = vmatprep.subr.mxu1 %v908_v0  ;;  %v273_v24 = vld [vmem:[#allocation5 + $0x18] sm:$0xff]  ;;  %v367_v25 = vld [vmem:[#allocation7 + $0x20] sm:$0xff]  ;;  %v272_v26 = vld [vmem:[#allocation5 + $0x10] sm:$0xff]  ;;  %p836_p2 = pneg %p835_p1 }
  0x5e   : > { %v366_v27 = vld [vmem:[#allocation7 + $0x18] sm:$0xff]  ;;  %v271_v28 = vld [vmem:[#allocation5 + $0x8] sm:$0xff]  ;;  %v365_v29 = vld [vmem:[#allocation7 + $0x10] sm:$0xff]  ;;  %p842_p7 = por %p841_p12, %p840_p6 }
  0x5f   : > { %v270_v30 = vld [vmem:[#allocation5] sm:$0xff]  ;;  %v364_v31 = vld [vmem:[#allocation7 + $0x8] sm:$0xff]  ;;  %v269_v32 = vld [vmem:[%s1065_s17] sm:$0xff] }
  0x60   : > { %617 = vmatpush3.xpose.msra.mxu0 %v283_v4  ;;  %652 = vmatpush3.xpose.msra.mxu1 %v376_v7  ;;  %v363_v33 = vld [vmem:[#allocation7] sm:$0xff]  ;;  %v572_v34 = vld [vmem:[%s1161_s2] ss:$0 sm:$0xff]  ;;  %p843_p9 = pnand %p842_p7, %p836_p2 }
  0x61   : > { %618 = vmatprep.subr.mxu0 %v908_v0  ;;  %653 = vmatprep.subr.mxu1 %v908_v0  ;;  %v573_v38 = vld [vmem:[%s1163_s4] ss:$0 sm:$0xff] }
  0x64   : > { %619 = vmatpush3.xpose.msra.mxu0 %v282_v6  ;;  %654 = vmatpush3.xpose.msra.mxu1 %v375_v9 }
  0x65   : > { %620 = vmatprep.subr.mxu0 %v908_v0  ;;  %655 = vmatprep.subr.mxu1 %v908_v0 }
  0x68   : > { %621 = vmatpush3.xpose.msra.mxu0 %v281_v8  ;;  %656 = vmatpush3.xpose.msra.mxu1 %v374_v11 }
  0x69   : > { %622 = vmatprep.subr.mxu0 %v908_v0  ;;  %657 = vmatprep.subr.mxu1 %v908_v0 }
  0x6c   : > { %623 = vmatpush3.xpose.msra.mxu0 %v280_v10  ;;  %658 = vmatpush3.xpose.msra.mxu1 %v373_v13 }
  0x6d   : > { %624 = vmatprep.subr.mxu0 %v908_v0  ;;  %659 = vmatprep.subr.mxu1 %v908_v0 }
  0x70   : > { %625 = vmatpush3.xpose.msra.mxu0 %v279_v12  ;;  %660 = vmatpush3.xpose.msra.mxu1 %v372_v15 }
  0x71   : > { %626 = vmatprep.subr.mxu0 %v908_v0  ;;  %661 = vmatprep.subr.mxu1 %v908_v0 }
  0x74   : > { %627 = vmatpush3.xpose.msra.mxu0 %v278_v14  ;;  %662 = vmatpush3.xpose.msra.mxu1 %v371_v17 }
  0x75   : > { %628 = vmatprep.subr.mxu0 %v908_v0  ;;  %663 = vmatprep.subr.mxu1 %v908_v0 }
  0x78   : > { %629 = vmatpush3.xpose.msra.mxu0 %v277_v16  ;;  %664 = vmatpush3.xpose.msra.mxu1 %v370_v19 }
  0x79   : > { %630 = vmatprep.subr.mxu0 %v908_v0  ;;  %665 = vmatprep.subr.mxu1 %v908_v0 }
  0x7c   : > { %631 = vmatpush3.xpose.msra.mxu0 %v276_v18  ;;  %666 = vmatpush3.xpose.msra.mxu1 %v369_v21 }
  0x7d   : > { %632 = vmatprep.subr.mxu0 %v908_v0  ;;  %667 = vmatprep.subr.mxu1 %v908_v0 }
  0x80   : > { %633 = vmatpush3.xpose.msra.mxu0 %v275_v20  ;;  %668 = vmatpush3.xpose.msra.mxu1 %v368_v23 }
  0x81   : > { %634 = vmatprep.subr.mxu0 %v908_v0  ;;  %669 = vmatprep.subr.mxu1 %v908_v0 }
  0x84   : > { %635 = vmatpush3.xpose.msra.mxu0 %v274_v22  ;;  %670 = vmatpush3.xpose.msra.mxu1 %v367_v25 }
  0x85   : > { %636 = vmatprep.subr.mxu0 %v908_v0  ;;  %671 = vmatprep.subr.mxu1 %v908_v0 }
  0x88   : > { %637 = vmatpush3.xpose.msra.mxu0 %v273_v24  ;;  %672 = vmatpush3.xpose.msra.mxu1 %v366_v27 }
  0x89   : > { %638 = vmatprep.subr.mxu0 %v908_v0  ;;  %673 = vmatprep.subr.mxu1 %v908_v0 }
  0x8c   : > { %639 = vmatpush3.xpose.msra.mxu0 %v272_v26  ;;  %674 = vmatpush3.xpose.msra.mxu1 %v365_v29 }
  0x8d   : > { %640 = vmatprep.subr.mxu0 %v908_v0  ;;  %675 = vmatprep.subr.mxu1 %v908_v0 }
  0x90   : > { %641 = vmatpush3.xpose.msra.mxu0 %v271_v28  ;;  %676 = vmatpush3.xpose.msra.mxu1 %v364_v31 }
  0x91   : > { %642 = vmatprep.subr.mxu0 %v908_v0  ;;  %677 = vmatprep.subr.mxu1 %v908_v0 }
  0x94   : > { %643 = vmatpush3.xpose.msra.mxu0 %v270_v30  ;;  %678 = vmatpush3.xpose.msra.mxu1 %v363_v33 }
  0x97   : > { %645 = vmatmul.mubr.f32.vlgmr.msra.gmra.mxu0 %v269_v32 }
 0x157   : > { %v359_v35 = vpop.f32.mrf.mxu0 }
 0x158   : > { %v360_v36 = vadd.f32 %v572_v34, %v359_v35 }
 0x159   : > { %v646_v37 = vpop.f32.mrf.mxu0 }
 0x15a   : > { %680 = vmatmul.mubr.f32.vlgmr.msra.gmra.mxu1 %v360_v36 }
 0x21a   : > { %v452_v39 = vpop.f32.mrf.mxu1 }
 0x21b   : > { %v453_v40 = vadd.f32 %v573_v38, %v452_v39 }
 0x21c   : > { %v681_v41 = vpop.f32.mrf.mxu1 }
 0x21d   : > { %456 = vst [vmem:[%s268_s12] sm:$0xff] %v453_v40 }
 0x21e   : > { %846 = shalt.err (!%p843_p9)
}
 0x21f   : > { %s847_s17 = scalar_lea.hbm %s1122_s28, 128  ;;  %s851_s26 = scalar_lea.hbm %s1164_s5, 256 }
 0x220   : > { %p848_p13 = scmp.ne.s32.totalorder %s1122_s28, %s847_s17  ;;  %p852_p4 = scmp.lt.s32.totalorder %s1122_s28, %s1164_s5 }
 0x221   : > { %p853_p8 = scmp.lt.s32.totalorder %s851_s26, %s847_s17 }
 0x222   : > { %p849_p5 = pnand %p848_p13, %p1180_p0 }
 0x223   : > { %p854_p3 = por %p853_p8, %p852_p4 }
 0x224   : > { %p850_p10 = pneg %p849_p5 }
 0x226   : > { %p855_p11 = pnand %p854_p3, %p850_p10 }
 0x228   : > { %858 = shalt.err (!%p855_p11)
}
 0x229   : > { %692 = dma.vmem_to_hbm [thread:$0]  (%p1180_p0), %s472_s30, 128, %s1122_s28, %s458_s7  }
 0x22a PF: > { %s483_s11 = sand.u32 1, %s889_s18   ;;  %p1181_p1 = scmp.ne.s32.totalorder %s1170_s25, 0 }
 0x22b   : > { %p1182_p2 = scmp.ge.s32.totalorder %s901_s21, 2  ;;  %s484_s12 = scalar_lea.sflag [#allocation4], %s483_s11 }
 0x22d   : > { %p706_p6 = pnand %p1182_p2, %p1181_p1 }
 0x22f   : > { %p707_p12 = pneg %p706_p6 }
 0x231   : > { %884 = dma.done.wait (%p707_p12), %s484_s12, 128  }
 0x232   : > { %886 = vsyncadd (%p707_p12), %s484_s12, 4294967168  ;;  %p19_p7 = scmp.ge.s32.totalorder %s1013_s15, 4   ;;  %s1183_s18 = smov %s893_s19 }
 0x233   : > { %s1184_s19 = smov %s897_s20  ;;  %s1185_s20 = smov %s1029_s27 }
 0x234   : > { %s1186_s21 = smov %s1013_s15  ;;  %21 = sbr.rel (!%p19_p7) target bundleno = 6 (0x6), region = 93 }
 0x239   :  { %489 = vsyncpa [#allocation3], 1 }
 0x23a   :  { %491 = vsyncpa [#allocation3 + $0x1], 1 }
 0x23b   :  { %492 = vsyncpa [#allocation6], 1 }
 0x23c   :  { %493 = vsyncpa [#allocation4], 1 }
 0x23d   :  { %495 = vsyncpa [#allocation4 + $0x1], 1 }

</bundles_post_ra>
